<compile_context>
chip_gen: v5e
topology: v5e:2x2
jax: 0.10.0
libtpu: 0.0.40
codegen_flags: <defaults>
</compile_context>

<pallas_src>
import functools

import jax
import jax.numpy as jnp
import numpy as np
from jax.experimental import pallas as pl
from jax.experimental.pallas import tpu as pltpu

SIGMA_MIN = 1e-6  # self.sigma_min


def _cfm_forward_kernel(
    # SMEM scalar inputs (whole-array resident)
    plen_ref, xlen_ref, t_ref,
    # VMEM inputs
    x1_ref, z_ref, mu_ref, cond_ref, wy_ref, wp_ref, wmu_ref,
    # outputs
    y_ref, loss_ref,
    *, bt_block, c_logical,
):
    i = pl.program_id(0)

    # Tiny resident weights: load once per grid step, reuse across the batch tile.
    wy = wy_ref[...]      # (C, C) bf16
    wp = wp_ref[...]      # (C, C) bf16
    wmu = wmu_ref[...]    # (C, C) bf16

    # Short static unroll over the batch tile (Bt is small; iterations independent).
    for bt in range(bt_block):
        g = i * bt_block + bt          # global batch index
        plen = plen_ref[g]             # prompt_lens[g] (int32, SMEM)
        xlen = xlen_ref[g]             # x_lens[g]      (int32, SMEM)
        tt = t_ref[g]                  # t[g]           (f32,   SMEM)

        x1 = x1_ref[bt]                # (C, T) f32, logical (unpadded) shape
        z = z_ref[bt]                  # (C, T) f32
        C, T = x1.shape

        tidx = jax.lax.broadcasted_iota(jnp.int32, (C, T), 1)
        in_prompt = tidx < plen

        # y = (1 - (1 - sigma_min) * t) * z + t * x1 ;  u = x1 - (1 - sigma_min) * z
        y = (1.0 - (1.0 - SIGMA_MIN) * tt) * z + tt * x1
        u = x1 - (1.0 - SIGMA_MIN) * z

        # prompt[:, :plen] = x1[:, :plen];  y[:, :plen] = 0
        prompt = jnp.where(in_prompt, x1, 0.0)
        y = jnp.where(in_prompt, 0.0, y)
        # zero_prompt_speech_token defaults to False -> mu left untouched
        y_ref[bt] = y

        # Synthetic estimator: three small bf16 MXU matmuls, f32 accumulation.
        # Each operand consumed in place -- no concat buffer, no mu re-copy.
        est = jnp.dot(wy, y.astype(jnp.bfloat16), preferred_element_type=jnp.float32)
        est = est + jnp.dot(wp, prompt.astype(jnp.bfloat16),
                            preferred_element_type=jnp.float32)
        est = est + jnp.dot(wmu, mu_ref[bt].astype(jnp.bfloat16),
                            preferred_element_type=jnp.float32)
        est = est + cond_ref[g]        # (C, 1) style/time bias, broadcast over T

        # per-batch MSE over the slice [:, plen:xlen]  (criterion = MSELoss, mean)
        diff = est - u
        seq_mask = jnp.logical_and(tidx >= plen, tidx < xlen)
        sq = jnp.where(seq_mask, diff * diff, 0.0)
        cnt = (jnp.maximum(xlen - plen, 1) * c_logical).astype(jnp.float32)
        loss_ref[g] = jnp.sum(sq) / cnt


def basecfm_forward(x1, z, t, mu, style, prompt_lens, x_lens, params, *, block_b=2):
    """Returns (loss, y) exactly like BASECFM.forward (with the synthetic estimator)."""
    B, C, T = x1.shape
    wy, wp, wmu, ws, wt = params

    # Batch tile: largest divisor of B not exceeding block_b (keeps unroll small).
    bt_block = max(1, min(block_b, B))
    while B % bt_block != 0:
        bt_block -= 1
    num_tiles = B // bt_block

    # Degenerate style path (Ws @ style + wt * t) hoisted out of the kernel: B*C floats.
    cond = style @ ws.T + wt[:, 0][None, :] * t[:, None]          # (B, C) f32
    cond = cond.reshape(B, C, 1)

    wy_b = wy.astype(jnp.bfloat16)
    wp_b = wp.astype(jnp.bfloat16)
    wmu_b = wmu.astype(jnp.bfloat16)

    grid_spec = pltpu.PrefetchScalarGridSpec(
        num_scalar_prefetch=0,
        grid=(num_tiles,),
        in_specs=[
            pl.BlockSpec(memory_space=pltpu.SMEM),                    # prompt_lens (B,) i32
            pl.BlockSpec(memory_space=pltpu.SMEM),                    # x_lens      (B,) i32
            pl.BlockSpec(memory_space=pltpu.SMEM),                    # t           (B,) f32
            pl.BlockSpec((bt_block, C, T), lambda i: (i, 0, 0)),      # x1 (no pad)
            pl.BlockSpec((bt_block, C, T), lambda i: (i, 0, 0)),      # z  (no pad)
            pl.BlockSpec((bt_block, C, T), lambda i: (i, 0, 0)),      # mu (no pad, f32)
            pl.BlockSpec((B, C, 1), lambda i: (0, 0, 0)),             # cond bias, resident
            pl.BlockSpec((C, C), lambda i: (0, 0)),                   # Wy,  fetched once
            pl.BlockSpec((C, C), lambda i: (0, 0)),                   # Wp,  fetched once
            pl.BlockSpec((C, C), lambda i: (0, 0)),                   # Wmu, fetched once
        ],
        out_specs=[
            pl.BlockSpec((bt_block, C, T), lambda i: (i, 0, 0)),      # y, logical shape
            pl.BlockSpec(memory_space=pltpu.SMEM),                    # per-batch loss (B,)
        ],
    )

    flops = B * (3 * 2 * C * C * T + 10 * C * T)
    bytes_accessed = (B * C * T * (4 + 4 + 4 + 4)    # x1, z, mu in; y out (all f32)
                      + B * C * 4                    # cond
                      + 3 * C * C * 2                # weights (bf16)
                      + 3 * B * 4 + B * 4)           # scalars + loss

    y, loss_b = pl.pallas_call(
        functools.partial(_cfm_forward_kernel, bt_block=bt_block, c_logical=C),
        out_shape=(
            jax.ShapeDtypeStruct((B, C, T), jnp.float32),
            jax.ShapeDtypeStruct((B,), jnp.float32),
        ),
        grid_spec=grid_spec,
        # The whole-(B,) SMEM loss output stays resident across the grid -> the batch
        # axis must be "arbitrary" (and v5e/v6e have a single TensorCore anyway).
        compiler_params=pltpu.CompilerParams(dimension_semantics=("arbitrary",)),
        cost_estimate=pl.CostEstimate(flops=flops, transcendentals=0,
                                      bytes_accessed=bytes_accessed),
    )(prompt_lens, x_lens, t, x1, z, mu, cond, wy_b, wp_b, wmu_b)

    loss = jnp.sum(loss_b) / B    # loss /= b
    return loss, y


def reference_forward(x1, z, t, mu, style, prompt_lens, x_lens, params):
    """Pure-JAX reference with identical semantics (bf16 matmul operands, f32 accum)."""
    wy, wp, wmu, ws, wt = params
    B, C, T = x1.shape
    bf = jnp.bfloat16
    tt = t.reshape(B, 1, 1)
    y = (1.0 - (1.0 - SIGMA_MIN) * tt) * z + tt * x1
    u = x1 - (1.0 - SIGMA_MIN) * z
    tidx = jnp.arange(T)[None, None, :]
    in_prompt = tidx < prompt_lens[:, None, None]
    prompt = jnp.where(in_prompt, x1, 0.0)
    y = jnp.where(in_prompt, 0.0, y)
    est = (jnp.einsum("ij,bjt->bit", wy.astype(bf), y.astype(bf),
                      preferred_element_type=jnp.float32)
           + jnp.einsum("ij,bjt->bit", wp.astype(bf), prompt.astype(bf),
                        preferred_element_type=jnp.float32)
           + jnp.einsum("ij,bjt->bit", wmu.astype(bf), mu.astype(bf),
                        preferred_element_type=jnp.float32))
    cond = style @ ws.T + wt[:, 0][None, :] * t[:, None]
    est = est + cond[:, :, None]
    diff = est - u
    mask = (tidx >= prompt_lens[:, None, None]) & (tidx < x_lens[:, None, None])
    sq = jnp.where(mask, diff * diff, 0.0)
    cnt = (jnp.maximum(x_lens - prompt_lens, 1) * C).astype(jnp.float32)
    per = jnp.sum(sq, axis=(1, 2)) / cnt
    return jnp.mean(per), y


if __name__ == "__main__":
    B, C, T, S = 2, 12, 200, 32   # batch, n_feats/in_channels, mel_timesteps, style dim

    key = jax.random.PRNGKey(0)
    k_x1, k_z, k_t, k_mu, k_sty, k_wy, k_wp, k_wmu, k_ws, k_wt = jax.random.split(key, 10)

    x1 = jax.random.normal(k_x1, (B, C, T), dtype=jnp.float32)       # target
    z = jax.random.normal(k_z, (B, C, T), dtype=jnp.float32)         # torch.randn_like(x1)
    t = jax.random.uniform(k_t, (B,), dtype=jnp.float32)             # torch.rand([b,1,1])
    mu = jax.random.normal(k_mu, (B, C, T), dtype=jnp.float32)       # encoder output
    style = jax.random.normal(k_sty, (B, S), dtype=jnp.float32)      # style embedding

    prompt_lens = jnp.array([37, 61], dtype=jnp.int32)
    x_lens = jnp.array([150, 200], dtype=jnp.int32)

    scale = 0.1
    params = (
        scale * jax.random.normal(k_wy, (C, C), dtype=jnp.float32),
        scale * jax.random.normal(k_wp, (C, C), dtype=jnp.float32),
        scale * jax.random.normal(k_wmu, (C, C), dtype=jnp.float32),
        scale * jax.random.normal(k_ws, (C, S), dtype=jnp.float32),
        scale * jax.random.normal(k_wt, (C, 1), dtype=jnp.float32),
    )

    fwd = jax.jit(basecfm_forward)
    loss, y = jax.block_until_ready(
        fwd(x1, z, t, mu, style, prompt_lens, x_lens, params)
    )
    loss_ref, y_ref = reference_forward(x1, z, t, mu, style, prompt_lens, x_lens, params)

    assert np.allclose(np.asarray(y), np.asarray(y_ref), atol=1e-5), "y mismatch"
    assert np.allclose(float(loss), float(loss_ref), rtol=1e-3, atol=1e-3), "loss mismatch"
    print("KERNEL_OK")
</pallas_src>

<mosaic_0001>
module attributes {stable_mosaic.version = 11 : i64} {
  func.func @_cfm_forward_kernel(%arg0: i32, %arg1: memref<2xi32, #tpu.memory_space<smem>>, %arg2: memref<2xi32, #tpu.memory_space<smem>>, %arg3: memref<2xf32, #tpu.memory_space<smem>>, %arg4: memref<2x12x200xf32, #tpu.memory_space<vmem>>, %arg5: memref<2x12x200xf32, #tpu.memory_space<vmem>>, %arg6: memref<2x12x200xf32, #tpu.memory_space<vmem>>, %arg7: memref<2x12x1xf32, #tpu.memory_space<vmem>>, %arg8: memref<12x12xbf16, #tpu.memory_space<vmem>>, %arg9: memref<12x12xbf16, #tpu.memory_space<vmem>>, %arg10: memref<12x12xbf16, #tpu.memory_space<vmem>>, %arg11: memref<2x12x200xf32, #tpu.memory_space<vmem>>, %arg12: memref<2xf32, #tpu.memory_space<smem>>) attributes {dimension_semantics = [#tpu.dimension_semantics<arbitrary>], iteration_bounds = array<i64: 1>, scalar_prefetch = 0 : i64, scratch_operands = 0 : i64, tpu.core_type = #tpu.core_type<tc>, window_params = [{transform_indices = @transform_0, window_bounds = array<i64: 2>}, {transform_indices = @transform_1, window_bounds = array<i64: 2>}, {transform_indices = @transform_2, window_bounds = array<i64: 2>}, {transform_indices = @transform_3, window_bounds = array<i64: 2, 12, 200>}, {transform_indices = @transform_4, window_bounds = array<i64: 2, 12, 200>}, {transform_indices = @transform_5, window_bounds = array<i64: 2, 12, 200>}, {pipeline_mode = #tpu.pipeline_mode<synchronous>, transform_indices = @transform_6, window_bounds = array<i64: 2, 12, 1>}, {pipeline_mode = #tpu.pipeline_mode<synchronous>, transform_indices = @transform_7, window_bounds = array<i64: 12, 12>}, {pipeline_mode = #tpu.pipeline_mode<synchronous>, transform_indices = @transform_8, window_bounds = array<i64: 12, 12>}, {pipeline_mode = #tpu.pipeline_mode<synchronous>, transform_indices = @transform_9, window_bounds = array<i64: 12, 12>}, {transform_indices = @transform_10, window_bounds = array<i64: 2, 12, 200>}, {transform_indices = @transform_11, window_bounds = array<i64: 2>}]} {
    %c0 = arith.constant 0 : index
    %c0_0 = arith.constant 0 : index
    %0 = vector.load %arg8[%c0, %c0_0] : memref<12x12xbf16, #tpu.memory_space<vmem>>, vector<12x12xbf16>
    %c0_1 = arith.constant 0 : index
    %c0_2 = arith.constant 0 : index
    %1 = vector.load %arg9[%c0_1, %c0_2] : memref<12x12xbf16, #tpu.memory_space<vmem>>, vector<12x12xbf16>
    %c0_3 = arith.constant 0 : index
    %c0_4 = arith.constant 0 : index
    %2 = vector.load %arg10[%c0_3, %c0_4] : memref<12x12xbf16, #tpu.memory_space<vmem>>, vector<12x12xbf16>
    %c2_i32 = arith.constant 2 : i32
    %3 = arith.muli %arg0, %c2_i32 : i32
    %c0_i32 = arith.constant 0 : i32
    %4 = arith.addi %3, %c0_i32 : i32
    %5 = arith.index_cast %4 : i32 to index
    %6 = memref.load %arg1[%5] : memref<2xi32, #tpu.memory_space<smem>>
    %7 = arith.index_cast %4 : i32 to index
    %8 = memref.load %arg2[%7] : memref<2xi32, #tpu.memory_space<smem>>
    %9 = arith.index_cast %4 : i32 to index
    %10 = memref.load %arg3[%9] : memref<2xf32, #tpu.memory_space<smem>>
    %c0_5 = arith.constant 0 : index
    %c0_6 = arith.constant 0 : index
    %c0_7 = arith.constant 0 : index
    %11 = vector.load %arg4[%c0_5, %c0_6, %c0_7] : memref<2x12x200xf32, #tpu.memory_space<vmem>>, vector<1x12x200xf32>
    %12 = vector.shape_cast %11 : vector<1x12x200xf32> to vector<12x200xf32>
    %c0_8 = arith.constant 0 : index
    %c0_9 = arith.constant 0 : index
    %c0_10 = arith.constant 0 : index
    %13 = vector.load %arg5[%c0_8, %c0_9, %c0_10] : memref<2x12x200xf32, #tpu.memory_space<vmem>>, vector<1x12x200xf32>
    %14 = vector.shape_cast %13 : vector<1x12x200xf32> to vector<12x200xf32>
    %15 = tpu.iota {dimensions = array<i32: 1>} : vector<12x200xi32>
    %16 = vector.broadcast %6 : i32 to vector<12x200xi32>
    %17 = arith.cmpi slt, %15, %16 : vector<12x200xi32>
    %cst = arith.constant 0.999998986 : f32
    %18 = arith.mulf %cst, %10 : f32
    %cst_11 = arith.constant 1.000000e+00 : f32
    %19 = arith.subf %cst_11, %18 : f32
    %20 = vector.broadcast %19 : f32 to vector<12x200xf32>
    %21 = arith.mulf %20, %14 : vector<12x200xf32>
    %22 = vector.broadcast %10 : f32 to vector<12x200xf32>
    %23 = arith.mulf %22, %12 : vector<12x200xf32>
    %24 = arith.addf %21, %23 : vector<12x200xf32>
    %cst_12 = arith.constant 0.999998986 : f32
    %25 = vector.broadcast %cst_12 : f32 to vector<12x200xf32>
    %26 = arith.mulf %25, %14 : vector<12x200xf32>
    %27 = arith.subf %12, %26 : vector<12x200xf32>
    %cst_13 = arith.constant 0.000000e+00 : f32
    %28 = vector.broadcast %cst_13 : f32 to vector<12x200xf32>
    %29 = arith.select %17, %12, %28 : vector<12x200xi1>, vector<12x200xf32>
    %cst_14 = arith.constant 0.000000e+00 : f32
    %30 = vector.broadcast %cst_14 : f32 to vector<12x200xf32>
    %31 = arith.select %17, %30, %24 : vector<12x200xi1>, vector<12x200xf32>
    %c0_15 = arith.constant 0 : index
    %c0_16 = arith.constant 0 : index
    %c0_17 = arith.constant 0 : index
    %32 = vector.load %arg11[%c0_15, %c0_16, %c0_17] : memref<2x12x200xf32, #tpu.memory_space<vmem>>, vector<1x12x200xf32>
    %33 = vector.shape_cast %32 : vector<1x12x200xf32> to vector<12x200xf32>
    %34 = vector.shape_cast %31 : vector<12x200xf32> to vector<1x12x200xf32>
    tpu.vector_store %arg11[%c0_15, %c0_16, %c0_17], %34 {strides = array<i32>} : memref<2x12x200xf32, #tpu.memory_space<vmem>>, vector<1x12x200xf32>,
    %35 = arith.truncf %31 : vector<12x200xf32> to vector<12x200xbf16>
    %cst_18 = arith.constant dense<0.000000e+00> : vector<12x200xf32>
    %36 = tpu.matmul %0, %35, %cst_18 {dimension_numbers = #tpu.dot_dimension_numbers<[1], [0], [0], [1], [0, 0, 1, 1], [], []>} : vector<12x12xbf16>, vector<12x200xbf16>, vector<12x200xf32> -> vector<12x200xf32>
    %37 = arith.truncf %29 : vector<12x200xf32> to vector<12x200xbf16>
    %cst_19 = arith.constant dense<0.000000e+00> : vector<12x200xf32>
    %38 = tpu.matmul %1, %37, %cst_19 {dimension_numbers = #tpu.dot_dimension_numbers<[1], [0], [0], [1], [0, 0, 1, 1], [], []>} : vector<12x12xbf16>, vector<12x200xbf16>, vector<12x200xf32> -> vector<12x200xf32>
    %39 = arith.addf %36, %38 : vector<12x200xf32>
    %c0_20 = arith.constant 0 : index
    %c0_21 = arith.constant 0 : index
    %c0_22 = arith.constant 0 : index
    %40 = vector.load %arg6[%c0_20, %c0_21, %c0_22] : memref<2x12x200xf32, #tpu.memory_space<vmem>>, vector<1x12x200xf32>
    %41 = vector.shape_cast %40 : vector<1x12x200xf32> to vector<12x200xf32>
    %42 = arith.truncf %41 : vector<12x200xf32> to vector<12x200xbf16>
    %cst_23 = arith.constant dense<0.000000e+00> : vector<12x200xf32>
    %43 = tpu.matmul %2, %42, %cst_23 {dimension_numbers = #tpu.dot_dimension_numbers<[1], [0], [0], [1], [0, 0, 1, 1], [], []>} : vector<12x12xbf16>, vector<12x200xbf16>, vector<12x200xf32> -> vector<12x200xf32>
    %44 = arith.addf %39, %43 : vector<12x200xf32>
    %45 = arith.index_cast %4 : i32 to index
    %c0_24 = arith.constant 0 : index
    %c0_25 = arith.constant 0 : index
    %46 = vector.load %arg7[%45, %c0_24, %c0_25] : memref<2x12x1xf32, #tpu.memory_space<vmem>>, vector<1x12x1xf32>
    %47 = vector.shape_cast %46 : vector<1x12x1xf32> to vector<12x1xf32>
    %48 = vector.broadcast %47 : vector<12x1xf32> to vector<12x200xf32>
    %49 = arith.addf %44, %48 : vector<12x200xf32>
    %50 = arith.subf %49, %27 : vector<12x200xf32>
    %51 = vector.broadcast %6 : i32 to vector<12x200xi32>
    %52 = arith.cmpi sge, %15, %51 : vector<12x200xi32>
    %53 = vector.broadcast %8 : i32 to vector<12x200xi32>
    %54 = arith.cmpi slt, %15, %53 : vector<12x200xi32>
    %55 = arith.andi %52, %54 : vector<12x200xi1>
    %56 = arith.mulf %50, %50 : vector<12x200xf32>
    %cst_26 = arith.constant 0.000000e+00 : f32
    %57 = vector.broadcast %cst_26 : f32 to vector<12x200xf32>
    %58 = arith.select %55, %56, %57 : vector<12x200xi1>, vector<12x200xf32>
    %59 = arith.subi %8, %6 : i32
    %c1_i32 = arith.constant 1 : i32
    %60 = arith.maxsi %59, %c1_i32 : i32
    %c12_i32 = arith.constant 12 : i32
    %61 = arith.muli %60, %c12_i32 : i32
    %62 = arith.sitofp %61 : i32 to f32
    %63 = vector.shape_cast %58 : vector<12x200xf32> to vector<1x12x200xf32>
    %cst_27 = arith.constant dense<0.000000e+00> : vector<1xf32>
    %64 = vector.multi_reduction <add>, %63, %cst_27 [1, 2] : vector<1x12x200xf32> to vector<1xf32>
    %65 = vector.shape_cast %64 : vector<1xf32> to vector<1x1x1xf32>
    %66 = vector.extract %65[0, 0, 0] : f32 from vector<1x1x1xf32>
    %67 = arith.divf %66, %62 : f32
    %68 = arith.index_cast %4 : i32 to index
    %69 = memref.load %arg12[%68] : memref<2xf32, #tpu.memory_space<smem>>
    memref.store %67, %arg12[%68] : memref<2xf32, #tpu.memory_space<smem>>
    %c2_i32_28 = arith.constant 2 : i32
    %70 = arith.muli %arg0, %c2_i32_28 : i32
    %c1_i32_29 = arith.constant 1 : i32
    %71 = arith.addi %70, %c1_i32_29 : i32
    %72 = arith.index_cast %71 : i32 to index
    %73 = memref.load %arg1[%72] : memref<2xi32, #tpu.memory_space<smem>>
    %74 = arith.index_cast %71 : i32 to index
    %75 = memref.load %arg2[%74] : memref<2xi32, #tpu.memory_space<smem>>
    %76 = arith.index_cast %71 : i32 to index
    %77 = memref.load %arg3[%76] : memref<2xf32, #tpu.memory_space<smem>>
    %c1 = arith.constant 1 : index
    %c0_30 = arith.constant 0 : index
    %c0_31 = arith.constant 0 : index
    %78 = vector.load %arg4[%c1, %c0_30, %c0_31] : memref<2x12x200xf32, #tpu.memory_space<vmem>>, vector<1x12x200xf32>
    %79 = vector.shape_cast %78 : vector<1x12x200xf32> to vector<12x200xf32>
    %c1_32 = arith.constant 1 : index
    %c0_33 = arith.constant 0 : index
    %c0_34 = arith.constant 0 : index
    %80 = vector.load %arg5[%c1_32, %c0_33, %c0_34] : memref<2x12x200xf32, #tpu.memory_space<vmem>>, vector<1x12x200xf32>
    %81 = vector.shape_cast %80 : vector<1x12x200xf32> to vector<12x200xf32>
    %82 = tpu.iota {dimensions = array<i32: 1>} : vector<12x200xi32>
    %83 = vector.broadcast %73 : i32 to vector<12x200xi32>
    %84 = arith.cmpi slt, %82, %83 : vector<12x200xi32>
    %cst_35 = arith.constant 0.999998986 : f32
    %85 = arith.mulf %cst_35, %77 : f32
    %cst_36 = arith.constant 1.000000e+00 : f32
    %86 = arith.subf %cst_36, %85 : f32
    %87 = vector.broadcast %86 : f32 to vector<12x200xf32>
    %88 = arith.mulf %87, %81 : vector<12x200xf32>
    %89 = vector.broadcast %77 : f32 to vector<12x200xf32>
    %90 = arith.mulf %89, %79 : vector<12x200xf32>
    %91 = arith.addf %88, %90 : vector<12x200xf32>
    %cst_37 = arith.constant 0.999998986 : f32
    %92 = vector.broadcast %cst_37 : f32 to vector<12x200xf32>
    %93 = arith.mulf %92, %81 : vector<12x200xf32>
    %94 = arith.subf %79, %93 : vector<12x200xf32>
    %cst_38 = arith.constant 0.000000e+00 : f32
    %95 = vector.broadcast %cst_38 : f32 to vector<12x200xf32>
    %96 = arith.select %84, %79, %95 : vector<12x200xi1>, vector<12x200xf32>
    %cst_39 = arith.constant 0.000000e+00 : f32
    %97 = vector.broadcast %cst_39 : f32 to vector<12x200xf32>
    %98 = arith.select %84, %97, %91 : vector<12x200xi1>, vector<12x200xf32>
    %c1_40 = arith.constant 1 : index
    %c0_41 = arith.constant 0 : index
    %c0_42 = arith.constant 0 : index
    %99 = vector.load %arg11[%c1_40, %c0_41, %c0_42] : memref<2x12x200xf32, #tpu.memory_space<vmem>>, vector<1x12x200xf32>
    %100 = vector.shape_cast %99 : vector<1x12x200xf32> to vector<12x200xf32>
    %101 = vector.shape_cast %98 : vector<12x200xf32> to vector<1x12x200xf32>
    tpu.vector_store %arg11[%c1_40, %c0_41, %c0_42], %101 {strides = array<i32>} : memref<2x12x200xf32, #tpu.memory_space<vmem>>, vector<1x12x200xf32>,
    %102 = arith.truncf %98 : vector<12x200xf32> to vector<12x200xbf16>
    %cst_43 = arith.constant dense<0.000000e+00> : vector<12x200xf32>
    %103 = tpu.matmul %0, %102, %cst_43 {dimension_numbers = #tpu.dot_dimension_numbers<[1], [0], [0], [1], [0, 0, 1, 1], [], []>} : vector<12x12xbf16>, vector<12x200xbf16>, vector<12x200xf32> -> vector<12x200xf32>
    %104 = arith.truncf %96 : vector<12x200xf32> to vector<12x200xbf16>
    %cst_44 = arith.constant dense<0.000000e+00> : vector<12x200xf32>
    %105 = tpu.matmul %1, %104, %cst_44 {dimension_numbers = #tpu.dot_dimension_numbers<[1], [0], [0], [1], [0, 0, 1, 1], [], []>} : vector<12x12xbf16>, vector<12x200xbf16>, vector<12x200xf32> -> vector<12x200xf32>
    %106 = arith.addf %103, %105 : vector<12x200xf32>
    %c1_45 = arith.constant 1 : index
    %c0_46 = arith.constant 0 : index
    %c0_47 = arith.constant 0 : index
    %107 = vector.load %arg6[%c1_45, %c0_46, %c0_47] : memref<2x12x200xf32, #tpu.memory_space<vmem>>, vector<1x12x200xf32>
    %108 = vector.shape_cast %107 : vector<1x12x200xf32> to vector<12x200xf32>
    %109 = arith.truncf %108 : vector<12x200xf32> to vector<12x200xbf16>
    %cst_48 = arith.constant dense<0.000000e+00> : vector<12x200xf32>
    %110 = tpu.matmul %2, %109, %cst_48 {dimension_numbers = #tpu.dot_dimension_numbers<[1], [0], [0], [1], [0, 0, 1, 1], [], []>} : vector<12x12xbf16>, vector<12x200xbf16>, vector<12x200xf32> -> vector<12x200xf32>
    %111 = arith.addf %106, %110 : vector<12x200xf32>
    %112 = arith.index_cast %71 : i32 to index
    %c0_49 = arith.constant 0 : index
    %c0_50 = arith.constant 0 : index
    %113 = vector.load %arg7[%112, %c0_49, %c0_50] : memref<2x12x1xf32, #tpu.memory_space<vmem>>, vector<1x12x1xf32>
    %114 = vector.shape_cast %113 : vector<1x12x1xf32> to vector<12x1xf32>
    %115 = vector.broadcast %114 : vector<12x1xf32> to vector<12x200xf32>
    %116 = arith.addf %111, %115 : vector<12x200xf32>
    %117 = arith.subf %116, %94 : vector<12x200xf32>
    %118 = vector.broadcast %73 : i32 to vector<12x200xi32>
    %119 = arith.cmpi sge, %82, %118 : vector<12x200xi32>
    %120 = vector.broadcast %75 : i32 to vector<12x200xi32>
    %121 = arith.cmpi slt, %82, %120 : vector<12x200xi32>
    %122 = arith.andi %119, %121 : vector<12x200xi1>
    %123 = arith.mulf %117, %117 : vector<12x200xf32>
    %cst_51 = arith.constant 0.000000e+00 : f32
    %124 = vector.broadcast %cst_51 : f32 to vector<12x200xf32>
    %125 = arith.select %122, %123, %124 : vector<12x200xi1>, vector<12x200xf32>
    %126 = arith.subi %75, %73 : i32
    %c1_i32_52 = arith.constant 1 : i32
    %127 = arith.maxsi %126, %c1_i32_52 : i32
    %c12_i32_53 = arith.constant 12 : i32
    %128 = arith.muli %127, %c12_i32_53 : i32
    %129 = arith.sitofp %128 : i32 to f32
    %130 = vector.shape_cast %125 : vector<12x200xf32> to vector<1x12x200xf32>
    %cst_54 = arith.constant dense<0.000000e+00> : vector<1xf32>
    %131 = vector.multi_reduction <add>, %130, %cst_54 [1, 2] : vector<1x12x200xf32> to vector<1xf32>
    %132 = vector.shape_cast %131 : vector<1xf32> to vector<1x1x1xf32>
    %133 = vector.extract %132[0, 0, 0] : f32 from vector<1x1x1xf32>
    %134 = arith.divf %133, %129 : f32
    %135 = arith.index_cast %71 : i32 to index
    %136 = memref.load %arg12[%135] : memref<2xf32, #tpu.memory_space<smem>>
    memref.store %134, %arg12[%135] : memref<2xf32, #tpu.memory_space<smem>>
    return
  }
  func.func @transform_0(%arg0: i32) -> i32 {
    %c0_i32 = arith.constant 0 : i32
    %c0_i32_0 = arith.constant 0 : i32
    return %c0_i32 : i32
  }
  func.func @transform_1(%arg0: i32) -> i32 {
    %c0_i32 = arith.constant 0 : i32
    %c0_i32_0 = arith.constant 0 : i32
    return %c0_i32 : i32
  }
  func.func @transform_2(%arg0: i32) -> i32 {
    %c0_i32 = arith.constant 0 : i32
    %c0_i32_0 = arith.constant 0 : i32
    return %c0_i32 : i32
  }
  func.func @transform_3(%arg0: i32) -> (i32, i32, i32) {
    %c0_i32 = arith.constant 0 : i32
    %c0_i32_0 = arith.constant 0 : i32
    %c0_i32_1 = arith.constant 0 : i32
    return %arg0, %c0_i32, %c0_i32_0 : i32, i32, i32
  }
  func.func @transform_4(%arg0: i32) -> (i32, i32, i32) {
    %c0_i32 = arith.constant 0 : i32
    %c0_i32_0 = arith.constant 0 : i32
    %c0_i32_1 = arith.constant 0 : i32
    return %arg0, %c0_i32, %c0_i32_0 : i32, i32, i32
  }
  func.func @transform_5(%arg0: i32) -> (i32, i32, i32) {
    %c0_i32 = arith.constant 0 : i32
    %c0_i32_0 = arith.constant 0 : i32
    %c0_i32_1 = arith.constant 0 : i32
    return %arg0, %c0_i32, %c0_i32_0 : i32, i32, i32
  }
  func.func @transform_6(%arg0: i32) -> (i32, i32, i32) {
    %c0_i32 = arith.constant 0 : i32
    %c0_i32_0 = arith.constant 0 : i32
    %c0_i32_1 = arith.constant 0 : i32
    %c0_i32_2 = arith.constant 0 : i32
    return %c0_i32, %c0_i32_0, %c0_i32_1 : i32, i32, i32
  }
  func.func @transform_7(%arg0: i32) -> (i32, i32) {
    %c0_i32 = arith.constant 0 : i32
    %c0_i32_0 = arith.constant 0 : i32
    %c0_i32_1 = arith.constant 0 : i32
    return %c0_i32, %c0_i32_0 : i32, i32
  }
  func.func @transform_8(%arg0: i32) -> (i32, i32) {
    %c0_i32 = arith.constant 0 : i32
    %c0_i32_0 = arith.constant 0 : i32
    %c0_i32_1 = arith.constant 0 : i32
    return %c0_i32, %c0_i32_0 : i32, i32
  }
  func.func @transform_9(%arg0: i32) -> (i32, i32) {
    %c0_i32 = arith.constant 0 : i32
    %c0_i32_0 = arith.constant 0 : i32
    %c0_i32_1 = arith.constant 0 : i32
    return %c0_i32, %c0_i32_0 : i32, i32
  }
  func.func @transform_10(%arg0: i32) -> (i32, i32, i32) {
    %c0_i32 = arith.constant 0 : i32
    %c0_i32_0 = arith.constant 0 : i32
    %c0_i32_1 = arith.constant 0 : i32
    return %arg0, %c0_i32, %c0_i32_0 : i32, i32, i32
  }
  func.func @transform_11(%arg0: i32) -> i32 {
    %c0_i32 = arith.constant 0 : i32
    %c0_i32_0 = arith.constant 0 : i32
    return %c0_i32 : i32
  }
}

</mosaic_0001>

<bundles_post_ra>
// kernel: basecfm_forward.1
= control target key start
LH: loop header
LB: loop body
LE: loop exit
PB: predicated region body
PF: predicated region fallthrough
CT: control target
= control target key end

     0   :  { %17 = vsyncpa [#allocation3], 0  ;;  %s1196_s0 = inlined_call_operand.vmem [shape: s32[2], index: 0, kind: input, shape index: {}]   ;;  %s1197_s1 = inlined_call_operand.vmem [shape: s32[2], index: 1, kind: input, shape index: {}]   ;;  %s1198_s2 = inlined_call_operand.vmem [shape: f32[2], index: 2, kind: input, shape index: {}]   ;;  %s1199_s3 = inlined_call_operand.vmem [shape: f32[2,12,200], index: 3, kind: input, shape index: {}]   ;;  %s1200_s4 = inlined_call_operand.vmem [shape: f32[2,12,200], index: 4, kind: input, shape index: {}]   ;;  %s1201_s5 = inlined_call_operand.vmem [shape: f32[2,12,200], index: 5, kind: input, shape index: {}]   ;;  %s1202_s6 = inlined_call_operand.vmem [shape: f32[2,12,1], index: 6, kind: input, shape index: {}]   ;;  %s1203_s7 = inlined_call_operand.vmem [shape: bf16[12,12], index: 7, kind: input, shape index: {}]   ;;  %s1204_s8 = inlined_call_operand.vmem [shape: bf16[12,12], index: 8, kind: input, shape index: {}]   ;;  %s1205_s9 = inlined_call_operand.vmem [shape: bf16[12,12], index: 9, kind: input, shape index: {}]   ;;  %s1206_s10 = inlined_call_operand.vmem [shape: f32[2,12,200], index: 10, kind: output, shape index: {0}]   ;;  %s1207_s11 = inlined_call_operand.vmem [shape: f32[2], index: 11, kind: output, shape index: {1}]  }
   0x1   :  { %18 = vsyncpa [#allocation6], 0  ;;  %s34_s19 = sshll.u32 %s1197_s1, 4  ;;  %s35_s19 = int_to_ptr.vmem [resolvable:$true] %s34_s19 }
   0x2   :  { %19 = vsyncpa [#allocation4], 0  ;;  %s25_s22 = sshll.u32 %s1196_s0, 4  ;;  %s747_s23 = smov [#allocation5]   ;;  %s26_s22 = int_to_ptr.vmem [resolvable:$true] %s25_s22 }
   0x3   :  { %37 = dma.vmem_to_smem %s35_s19, 16, %s747_s23, [#allocation6]  }
   0x4   :  { %s748_s24 = smov [#allocation2]   ;;  %s43_s27 = sshll.u32 %s1198_s2, 4  ;;  %s44_s27 = int_to_ptr.vmem [resolvable:$true] %s43_s27 }
   0x5   :  { %28 = dma.vmem_to_smem %s26_s22, 16, %s748_s24, [#allocation3]  }
   0x6   :  { %s749_s28 = smov [#allocation7]  }
   0x7   :  { %46 = dma.vmem_to_smem %s44_s27, 16, %s749_s28, [#allocation6]  }
   0x8   :  { %741 = dma.done.wait [#allocation3], 16  }
   0x9   :  { %742 = vsyncadd [#allocation3], 4294967280 }
   0xa   :  { %743 = dma.done.wait [#allocation6], 32  }
   0xb   :  { %744 = vsyncadd [#allocation6], 4294967264 }
   0xc   :  { %73 = sfence }
   0xd   :  { %s821_s1 = sld [smem:[#allocation2]]  ;;  %v93_v0 = vlaneseq  ;;  %v830_v2 = vld [vmem:[%s1199_s3 + $0x10] sm:$0xf]  ;;  %v628_v4 = vld [vmem:[%s1204_s8] sm:$0xf]  ;;  %v849_v7 = vld [vmem:[%s1199_s3 + $0x8] sm:$0xff] }
   0xe   :  { %s825_s0 = sld [smem:[#allocation7]]  ;;  %v672_v5 = vld [vmem:[%s1204_s8] sm:$0x30]  ;;  %v854_v8 = vld [vmem:[%s1199_s3 + $0x18] sm:$0xf]  ;;  %vm150_vm0 = vcmask 1045504  }
   0xf   :  { %v823_v1 = vand.u32 127, %v93_v0  ;;  %v844_v6 = vld [vmem:[%s1199_s3] sm:$0xff]  ;;  %s856_s21 = sld [smem:[#allocation2 + $0x1]]  ;;  %v870_v11 = vor.u32 %v672_v5, %v628_v4  ;;  %vm146_vm3 = vcmask 97280   ;;  %v229_v12 = vld [vmem:[%s1201_s5 + $0x10] sm:$0xf] }
  0x10   :  { %s861_s8 = sld [smem:[#allocation7 + $0x1]]  ;;  %v227_v10 = vld [vmem:[%s1201_s5] sm:$0xff]  ;;  %v900_v20 = vld [vmem:[%s1200_s4 + $0x10] sm:$0xf]  ;;  %v906_v22 = vld [vmem:[%s1200_s4 + $0x18] sm:$0xf] }
  0x11   :  { %v833_v3 = vadd.s32 128, %v823_v1  ;;  %v895_v19 = vld [vmem:[%s1200_s4] sm:$0xff]  ;;  %v231_v23 = vpack.c.bf16 %v229_v12, %v227_v10  ;;  %v913_v26 = vld [vmem:[%s1200_s4 + $0x8] sm:$0xff]  ;;  %vm132_vm4 = vcmask 588800   ;;  %v933_v34 = vld [vmem:[%s1199_s3 + $0x30] sm:$0xf] }
  0x12   :  { %v634_v29 = vld [vmem:[%s1203_s7] sm:$0xf]  ;;  %v671_v30 = vld [vmem:[%s1203_s7] sm:$0x30]  ;;  %v945_v39 = vld [vmem:[%s1199_s3 + $0x28] sm:$0xff]  ;;  %vm135_vm7 = vcmask 584704  }
  0x13   :  { %v859_v9 = vstv %s821_s1  ;;  %v928_v33 = vld [vmem:[%s1199_s3 + $0x20] sm:$0xff]  ;;  %v242_v36 = vsel %vm150_vm0, %v231_v23, 0  ;;  %v954_v44 = vor.u32 %v671_v30, %v634_v29  ;;  %v967_v47 = vld [vmem:[%s1199_s3 + $0x38] sm:$0xf]  ;;  %v228_v52 = vld [vmem:[%s1201_s5 + $0x8] sm:$0xff]  ;;  %vm323_vm14 = vcmask 1043456  }
  0x14   :  { %vm97_vm1 = vcmp.lt.s32.totalorder %v823_v1, %v859_v9  ;;  %vm98_vm2 = vcmp.lt.s32.totalorder %v833_v3, %v859_v9  ;;  %s99_s26 = smul.f32 0.999999, %s825_s0  ;;  %v106_v21 = vstv %s825_s0  ;;  %v230_v53 = vld [vmem:[%s1201_s5 + $0x18] sm:$0xf]  ;;  %v663_v58 = vld [vmem:[%s1201_s5 + $0x20] sm:$0xff]  ;;  %v664_v60 = vld [vmem:[%s1201_s5 + $0x28] sm:$0xff]  ;;  %vm302_vm8 = vcmp.ge.s32.totalorder %v833_v3, %v859_v9 }
  0x15   :  { %v123_v13 = vsel %vm97_vm1, %v844_v6, 0.0  ;;  %v125_v14 = vsel %vm97_vm1, %v830_v2, 0.0  ;;  %v124_v15 = vsel %vm98_vm2, %v849_v7, 0.0  ;;  %v126_v16 = vsel %vm98_vm2, %v854_v8, 0.0  ;;  %v665_v59 = vld [vmem:[%s1201_s5 + $0x30] sm:$0xf] }
  0x16   :  { %v139_v17 = vpack.c.bf16 %v125_v14, %v123_v13  ;;  %v140_v18 = vpack.c.bf16 %v126_v16, %v124_v15  ;;  %s100_s13 = ssub.f32 1.0, %s99_s26  ;;  %v107_v24 = vmul.f32 %v106_v21, %v844_v6  ;;  %v109_v25 = vmul.f32 %v106_v21, %v830_v2  ;;  %s373_s25 = smul.f32 0.999999, %s861_s8  ;;  %v666_v4 = vld [vmem:[%s1201_s5 + $0x38] sm:$0xf]  ;;  %v1020_v14 = vld [vmem:[%s1200_s4 + $0x20] sm:$0xff] }
  0x17   :  { %v108_v27 = vmul.f32 %v106_v21, %v849_v7  ;;  %v110_v28 = vmul.f32 %v106_v21, %v854_v8  ;;  %v936_v35 = vstv %s856_s21  ;;  %v380_v38 = vstv %s861_s8  ;;  %v1029_v21 = vld [vmem:[%s1200_s4 + $0x30] sm:$0xf]  ;;  %v1034_v23 = vld [vmem:[%s1200_s4 + $0x28] sm:$0xff]  ;;  %s751_s16 = smov [#allocation8]  }
  0x18   :  { %v152_v31 = vsel %vm150_vm0, %v139_v17, 0  ;;  %v155_v32 = vsel %vm150_vm0, %v140_v18, 0  ;;  %v101_v37 = vstv %s100_s13  ;;  %vm371_vm5 = vcmp.lt.s32.totalorder %v823_v1, %v936_v35  ;;  %s374_s0 = ssub.f32 1.0, %s373_s25  ;;  %v1045_v29 = vld [vmem:[%s1200_s4 + $0x38] sm:$0xf]  ;;  %s610_s13 = sshll.u32 %s1207_s11, 4  ;;  %s611_s13 = int_to_ptr.vmem [resolvable:$true] %s610_s13 }
  0x19   :  { %164 = vmatpush.bf16.msra.mxu0 %v152_v31  ;;  %178 = vmatpush.bf16.msra.mxu1 %v155_v32  ;;  %vm372_vm6 = vcmp.lt.s32.totalorder %v833_v3, %v936_v35  ;;  %v102_v40 = vmul.f32 %v101_v37, %v895_v19  ;;  %v104_v41 = vmul.f32 %v101_v37, %v900_v20  ;;  %v397_v45 = vsel %vm371_vm5, %v928_v33, 0.0 }
  0x1a   :  { %v103_v42 = vmul.f32 %v101_v37, %v913_v26  ;;  %v105_v43 = vmul.f32 %v101_v37, %v906_v22  ;;  %v399_v46 = vsel %vm371_vm5, %v933_v34, 0.0  ;;  %v398_v51 = vsel %vm372_vm6, %v945_v39, 0.0 }
  0x1b   :  { %v111_v48 = vadd.f32 %v107_v24, %v102_v40  ;;  %v113_v49 = vadd.f32 %v109_v25, %v104_v41  ;;  %v381_v55 = vmul.f32 %v928_v33, %v380_v38  ;;  %v383_v56 = vmul.f32 %v933_v34, %v380_v38 }
  0x1c   :  { %630 = vmatmul.msk.bf16.vlgmr.msra.gmra.mxu0 %vm146_vm3, %v870_v11  ;;  %631 = vmatmul.msk.bf16.vlgmr.msra.gmra.mxu1 %vm146_vm3, %v870_v11  ;;  %v112_v50 = vadd.f32 %v108_v27, %v103_v42  ;;  %v114_v54 = vadd.f32 %v110_v28, %v105_v43  ;;  %v412_v57 = vpack.c.bf16 %v399_v46, %v397_v45  ;;  %v400_v0 = vsel %vm372_vm6, %v967_v47, 0.0  ;;  %v640_v46 = vld [vmem:[%s1205_s9] sm:$0xf] }
  0x1d   :  { %254 = vmatpush.bf16.msrb.mxu0 %v242_v36  ;;  %v127_v61 = vsel %vm97_vm1, 0.0, %v111_v48  ;;  %v129_v62 = vsel %vm97_vm1, 0.0, %v113_v49  ;;  %v382_v12 = vmul.f32 %v945_v39, %v380_v38  ;;  %v413_v13 = vpack.c.bf16 %v400_v0, %v398_v51  ;;  %v673_v48 = vld [vmem:[%s1205_s9] sm:$0x30]  ;;  %v670_v0 = vld [vmem:[%s1202_s6 + $0x18] sm:$0xf] }
  0x1e   :  { %v128_v63 = vsel %vm98_vm2, 0.0, %v112_v50  ;;  %131 = vst [vmem:[%s1206_s10] sm:$0xff] %v127_v61  ;;  %v137_v5 = vpack.c.bf16 %v129_v62, %v127_v61  ;;  %v130_v10 = vsel %vm98_vm2, 0.0, %v114_v54  ;;  %v415_v16 = vsel %vm150_vm0, %v412_v57, 0  ;;  %v282_v54 = vld [vmem:[%s1202_s6 + $0x8] sm:$0xf] }
  0x1f   :  { %134 = vst [vmem:[%s1206_s10 + $0x10] sm:$0xf] %v129_v62  ;;  %v138_v15 = vpack.c.bf16 %v130_v10, %v128_v63  ;;  %v232_v17 = vpack.c.bf16 %v230_v53, %v228_v52  ;;  %v487_v18 = vpack.c.bf16 %v665_v59, %v663_v58  ;;  %v418_v25 = vsel %vm150_vm0, %v413_v13, 0 }
  0x20   :  { %v194_v24 = vsel %vm150_vm0, %v137_v5, 0  ;;  %133 = vst.msk [vmem:[%s1206_s10 + $0x8] sm:$0xff] %vm132_vm4, %v128_v63  ;;  %v488_v27 = vpack.c.bf16 %v666_v4, %v664_v60  ;;  %v375_v28 = vstv %s374_s0  ;;  %v384_v31 = vmul.f32 %v967_v47, %v380_v38  ;;  %v281_v38 = vld [vmem:[%s1202_s6] sm:$0xff]  ;;  %v669_v63 = vld [vmem:[%s1202_s6 + $0x10] sm:$0xff]  ;;  %s1122_s6 = sld [smem:[#allocation5]] }
  0x21   :  { %206 = vmatpush.bf16.msra.mxu2 %v194_v24  ;;  %136 = vst.msk [vmem:[%s1206_s10 + $0x18] sm:$0xf] %vm135_vm7, %v130_v10  ;;  %v197_v30 = vsel %vm150_vm0, %v138_v15, 0  ;;  %v245_v32 = vsel %vm150_vm0, %v232_v17, 0  ;;  %v376_v36 = vmul.f32 %v1020_v14, %v375_v28  ;;  %v490_v37 = vsel %vm150_vm0, %v487_v18, 0 }
  0x22   :  { %220 = vmatpush.bf16.msra.mxu3 %v197_v30  ;;  %v378_v40 = vmul.f32 %v1029_v21, %v375_v28  ;;  %v377_v41 = vmul.f32 %v1034_v23, %v375_v28  ;;  %268 = vmatpush.bf16.msrb.mxu1 %v245_v32  ;;  %v493_v42 = vsel %vm150_vm0, %v488_v27, 0  ;;  %v379_v45 = vmul.f32 %v1045_v29, %v375_v28 }
  0x23   :  { %v385_v43 = vadd.f32 %v381_v55, %v376_v36  ;;  %v750_v50 = vmov 0   ;;  %v641_v57 = vor.u32 %v673_v48, %v640_v46  ;;  %v116_v15 = vmul.f32 0.999999, %v913_v26 }
  0x24   :  { %636 = vmatmul.msk.bf16.vlgmr.msra.gmra.mxu2 %vm146_vm3, %v954_v44  ;;  %v387_v49 = vadd.f32 %v383_v56, %v378_v40  ;;  %687 = vset.pattern.permute.xlu0 %v750_v50  ;;  %v386_v51 = vadd.f32 %v382_v12, %v377_v41  ;;  %v388_v53 = vadd.f32 %v384_v31, %v379_v45  ;;  %v117_v40 = vmul.f32 0.999999, %v900_v20 }
  0x25   :  { %427 = vmatpush.bf16.msrb.mxu2 %v415_v16  ;;  %637 = vmatmul.msk.bf16.vlgmr.msra.gmra.mxu3 %vm146_vm3, %v954_v44  ;;  %v401_v52 = vsel %vm371_vm5, 0.0, %v385_v43  ;;  %v120_v31 = vsub.f32 %v849_v7, %v116_v15  ;;  %vm301_vm10 = vcmp.ge.s32.totalorder %v823_v1, %v859_v9  ;;  %vm550_vm15 = vcmp.ge.s32.totalorder %v833_v3, %v936_v35 }
  0x26   :  { %441 = vmatpush.bf16.msrb.mxu3 %v418_v25  ;;  %v403_v55 = vsel %vm371_vm5, 0.0, %v387_v49  ;;  %655 = vst [vmem:[%s1206_s10 + $0x20] sm:$0xff] %v401_v52  ;;  %285 = vperm.xlu0 %687, %v281_v38   ;;  %v402_v56 = vsel %vm372_vm6, 0.0, %v386_v51  ;;  %v404_v59 = vsel %vm372_vm6, 0.0, %v388_v53  ;;  %v303_v32 = vstv %s1122_s6  ;;  %s316_s26 = ssub.s32 %s1122_s6, %s821_s1 }
  0x27   :  { %657 = vst [vmem:[%s1206_s10 + $0x30] sm:$0xf] %v403_v55  ;;  %v410_v58 = vpack.c.bf16 %v403_v55, %v401_v52  ;;  %688 = vset.pattern.permute.xlu1 %v750_v50  ;;  %v411_v60 = vpack.c.bf16 %v404_v59, %v402_v56  ;;  %vm305_vm9 = vcmp.lt.s32.totalorder %v833_v3, %v303_v32  ;;  %p317_p0 = scmp.gt.s32.totalorder %s316_s26, 1 }
  0x28   :  { %656 = vst.msk [vmem:[%s1206_s10 + $0x28] sm:$0xff] %vm132_vm4, %v402_v56  ;;  %290 = vperm.xlu1 %688, %v282_v54   ;;  %vm304_vm11 = vcmp.lt.s32.totalorder %v823_v1, %v303_v32  ;;  %vm1140_vm12 = vmand %vm302_vm8, %vm305_vm9  ;;  %v121_v49 = vsub.f32 %v830_v2, %v117_v40  ;;  %vm549_vm1 = vcmp.ge.s32.totalorder %v823_v1, %v936_v35 }
  0x29   :  { %502 = vmatpush.bf16.msra.mxu2 %v490_v37  ;;  %v449_v61 = vsel %vm150_vm0, %v410_v58, 0  ;;  %658 = vst.msk [vmem:[%s1206_s10 + $0x38] sm:$0xf] %vm135_vm7, %v404_v59  ;;  %v452_v62 = vsel %vm150_vm0, %v411_v60, 0  ;;  %vm1146_vm13 = vmand %vm301_vm10, %vm304_vm11  ;;  %s1161_s10 = sld [smem:[#allocation5 + $0x1]]  ;;  %s1215_s26 = smov (!%p317_p0, %s316_s26), 1 }
  0x2a   :  { %516 = vmatpush.bf16.msra.mxu3 %v493_v42  ;;  %461 = vmatpush.bf16.msra.mxu0 %v449_v61  ;;  %v118_v42 = vmul.f32 0.999999, %v906_v22  ;;  %s319_s27 = smul.u32 12, %s1215_s26 }
  0x2b   :  { %475 = vmatpush.bf16.msra.mxu1 %v452_v62 }
  0x2c   :  { %642 = vmatmul.msk.bf16.vlgmr.msrb.gmra.mxu0 %vm146_vm3, %v641_v57  ;;  %643 = vmatmul.msk.bf16.vlgmr.msrb.gmra.mxu1 %vm146_vm3, %v641_v57  ;;  %v122_v52 = vsub.f32 %v854_v8, %v118_v42  ;;  %s320_s28 = scvt.s32.f32 %s319_s27 }
  0x2e   :  { %533 = vperm.xlu0 %687, %v669_v63  }
  0x2f   :  { %s564_s3 = ssub.s32 %s1161_s10, %s856_s21 }
  0x30   :  { %538 = vperm.xlu1 %688, %v670_v0   ;;  %p565_p1 = scmp.gt.s32.totalorder %s564_s3, 1 }
  0x32   :  { %s1217_s3 = smov (!%p565_p1, %s564_s3), 1 }
  0x33   :  { %s567_s29 = smul.u32 12, %s1217_s3 }
  0x34   :  { %659 = vmatmul.msk.bf16.vlgmr.msrb.gmra.mxu2 %vm146_vm3, %v870_v11 }
  0x35   :  { %660 = vmatmul.msk.bf16.vlgmr.msrb.gmra.mxu3 %vm146_vm3, %v870_v11  ;;  %v115_v11 = vmul.f32 0.999999, %v895_v19  ;;  %s568_s1 = scvt.s32.f32 %s567_s29 }
  0x37   :  { %v119_v30 = vsub.f32 %v844_v6, %v115_v11 }
  0x3c   :  { %661 = vmatmul.msk.bf16.vlgmr.msra.gmra.mxu0 %vm146_vm3, %v954_v44  ;;  %662 = vmatmul.msk.bf16.vlgmr.msra.gmra.mxu1 %vm146_vm3, %v954_v44 }
  0x44   :  { %667 = vmatmul.msk.bf16.vlgmr.msra.gmra.mxu2 %vm146_vm3, %v641_v57 }
  0x45   :  { %668 = vmatmul.msk.bf16.vlgmr.msra.gmra.mxu3 %vm146_vm3, %v641_v57 }
  0x98   :  { %v286_v25 = vpop.permute.xlu0 %285 }
  0x99   :  { %v166_v4 = vpop.f32.mrf.mxu0  ;;  %v180_v5 = vpop.f32.mrf.mxu1 }
  0x9a   :  { %v291_v48 = vpop.permute.xlu1 %290 }
  0xa1   :  { %v168_v10 = vpop.f32.mrf.mxu0  ;;  %v182_v12 = vpop.f32.mrf.mxu1 }
  0xa7   :  { %v208_v13 = vpop.f32.mrf.mxu2 }
  0xa8   :  { %v209_v16 = vadd.f32 %v208_v13, %v166_v4  ;;  %v222_v17 = vpop.f32.mrf.mxu3 }
  0xa9   :  { %v256_v18 = vpop.f32.mrf.mxu0  ;;  %v223_v44 = vadd.f32 %v222_v17, %v180_v5  ;;  %v270_v24 = vpop.f32.mrf.mxu1  ;;  %v389_v17 = vmul.f32 0.999999, %v1020_v14  ;;  %v391_v14 = vmul.f32 0.999999, %v1029_v21 }
  0xaa   :  { %v275_v27 = vadd.f32 %v256_v18, %v209_v16  ;;  %v390_v18 = vmul.f32 0.999999, %v1034_v23 }
  0xab   :  { %v276_v28 = vadd.f32 %v270_v24, %v223_v44 }
  0xac   :  { %v293_v36 = vadd.f32 %v286_v25, %v275_v27  ;;  %v394_v32 = vsub.f32 %v945_v39, %v390_v18 }
  0xad   :  { %v294_v37 = vadd.f32 %v286_v25, %v276_v28 }
  0xae   :  { %v297_v19 = vsub.f32 %v293_v36, %v119_v30  ;;  %v534_v30 = vpop.permute.xlu0 %533 }
  0xaf   :  { %v298_v26 = vsub.f32 %v294_v37, %v120_v31  ;;  %v210_v41 = vpop.f32.mrf.mxu2  ;;  %v393_v31 = vsub.f32 %v928_v33, %v389_v17  ;;  %v551_v37 = vstv %s1161_s10  ;;  %v584_v17 = vstv %s568_s1 }
  0xb0   :  { %v211_v43 = vadd.f32 %v210_v41, %v168_v10  ;;  %v224_v38 = vpop.f32.mrf.mxu3  ;;  %v308_v50 = vmul.f32 %v297_v19, %v297_v19  ;;  %vm553_vm0 = vcmp.lt.s32.totalorder %v833_v3, %v551_v37  ;;  %vm552_vm2 = vcmp.lt.s32.totalorder %v823_v1, %v551_v37 }
  0xb1   :  { %v258_v6 = vpop.f32.mrf.mxu0  ;;  %v309_v45 = vmul.f32 %v298_v26, %v298_v26  ;;  %v225_v7 = vadd.f32 %v224_v38, %v182_v12  ;;  %v272_v46 = vpop.f32.mrf.mxu1  ;;  %vm1176_vm3 = vmand %vm550_vm15, %vm553_vm0  ;;  %vm590_vm9 = vweird.f32 %v584_v17 }
  0xb2   :  { %v277_v22 = vadd.f32 %v258_v6, %v211_v43  ;;  %v312_v59 = vsel %vm1146_vm13, %v308_v50, 0.0  ;;  %v392_v43 = vmul.f32 0.999999, %v1045_v29  ;;  %vm554_vm5 = vmand %vm549_vm1, %vm552_vm2 }
  0xb3   :  { %v278_v51 = vadd.f32 %v272_v46, %v225_v7  ;;  %v313_v55 = vsel %vm1140_vm12, %v309_v45, 0.0  ;;  %v395_v45 = vsub.f32 %v933_v34, %v391_v14 }
  0xb4   :  { %v295_v53 = vadd.f32 %v291_v48, %v277_v22  ;;  %v321_v2 = vsel %vm132_vm4, %v313_v55, 0.0  ;;  %v396_v29 = vsub.f32 %v967_v47, %v392_v43 }
  0xb5   :  { %v296_v9 = vadd.f32 %v291_v48, %v278_v51  ;;  %v322_v63 = vadd.f32 %v321_v2, %v312_v59  ;;  %v539_v48 = vpop.permute.xlu1 %538  ;;  %v337_v59 = vstv %s320_s28 }
  0xb6   :  { %v299_v56 = vsub.f32 %v295_v53, %v121_v49  ;;  %689 = vrcp.f32 %v337_v59 }
  0xb7   :  { %v300_v57 = vsub.f32 %v296_v9, %v122_v52  ;;  %v429_v58 = vpop.f32.mrf.mxu2  ;;  %691 = vrcp.f32 %v584_v17 }
  0xb8   :  { %v310_v60 = vmul.f32 %v299_v56, %v299_v56  ;;  %v443_v61 = vpop.f32.mrf.mxu3 }
  0xb9   :  { %v311_v8 = vmul.f32 %v300_v57, %v300_v57  ;;  %v463_v15 = vpop.f32.mrf.mxu0  ;;  %v477_v16 = vpop.f32.mrf.mxu1 }
  0xba   :  { %v314_v62 = vsel %vm1146_vm13, %v310_v60, 0.0  ;;  %v464_v44 = vadd.f32 %v463_v15, %v429_v58  ;;  %v478_v24 = vadd.f32 %v477_v16, %v443_v61 }
  0xbb   :  { %v315_v0 = vsel %vm1140_vm12, %v311_v8, 0.0  ;;  %v324_v4 = vsel %vm323_vm14, %v314_v62, 0.0 }
  0xbc   :  { %v325_v5 = vadd.f32 %v324_v4, %v322_v63  ;;  %v326_v10 = vsel %vm135_vm7, %v315_v0, 0.0  ;;  %v690_v2 = vpop.eup %689  ;;  %v349_v4 = vand.u32 2147483648, %v337_v59 }
  0xbd   :  { %v339_v60 = vmul.f32 %v690_v2, %v337_v59  ;;  %vm344_vm6 = vweird.f32 %v690_v2 }
  0xbe   :  { %v327_v12 = vadd.f32 %v326_v10, %v325_v5  ;;  %v347_v10 = vand.u32 2147483647, %v337_v59 }
  0xbf   :  { %v431_v13 = vpop.f32.mrf.mxu2  ;;  %v340_v61 = vsub.f32 1.0, %v339_v60 }
  0xc0   :  { %v445_v11 = vpop.f32.mrf.mxu3  ;;  %328 = vadd.xlane.f32.xlu2 %v327_v12  ;;  %vm348_vm8 = vcmp.eq.f32.partialorder %v347_v10, 8.507059e+37 }
  0xc1   :  { %v465_v19 = vpop.f32.mrf.mxu0  ;;  %v479_v41 = vpop.f32.mrf.mxu1  ;;  %v341_v62 = vmul.f32 %v690_v2, %v340_v61 }
  0xc2   :  { %v466_v33 = vadd.f32 %v465_v19, %v431_v13  ;;  %v480_v38 = vadd.f32 %v479_v41, %v445_v11  ;;  %v350_v11 = vor.u32 1.1754944e-38, %v349_v4 }
  0xc3   :  { %v342_v5 = vadd.f32 %v690_v2, %v341_v62 }
  0xc7   :  { %v504_v25 = vpop.f32.mrf.mxu2 }
  0xc8   :  { %v523_v27 = vadd.f32 %v504_v25, %v464_v44  ;;  %v518_v28 = vpop.f32.mrf.mxu3 }
  0xc9   :  { %v524_v36 = vadd.f32 %v518_v28, %v478_v24  ;;  %v692_v24 = vpop.eup %691 }
  0xca   :  { %v541_v40 = vadd.f32 %v534_v30, %v523_v27  ;;  %v586_v25 = vmul.f32 %v692_v24, %v584_v17  ;;  %vm591_vm10 = vweird.f32 %v692_v24 }
  0xcb   :  { %v542_v26 = vadd.f32 %v534_v30, %v524_v36  ;;  %v596_v36 = vand.u32 2147483648, %v584_v17  ;;  %vm592_vm11 = vmor %vm590_vm9, %vm591_vm10 }
  0xcc   :  { %v545_v23 = vsub.f32 %v541_v40, %v393_v31  ;;  %v587_v27 = vsub.f32 1.0, %v586_v25  ;;  %v594_v40 = vand.u32 2147483647, %v584_v17 }
  0xcd   :  { %v546_v42 = vsub.f32 %v542_v26, %v394_v32  ;;  %v597_v41 = vor.u32 1.1754944e-38, %v596_v36 }
  0xce   :  { %v556_v46 = vmul.f32 %v545_v23, %v545_v23  ;;  %v588_v30 = vmul.f32 %v692_v24, %v587_v27  ;;  %vm595_vm12 = vcmp.eq.f32.partialorder %v594_v40, 8.507059e+37 }
  0xcf   :  { %v557_v39 = vmul.f32 %v546_v42, %v546_v42  ;;  %v506_v6 = vpop.f32.mrf.mxu2 }
  0xd0   :  { %v525_v3 = vadd.f32 %v506_v6, %v466_v33  ;;  %v520_v7 = vpop.f32.mrf.mxu3  ;;  %v560_v51 = vsel %vm554_vm5, %v556_v46, 0.0  ;;  %v589_v37 = vadd.f32 %v692_v24, %v588_v30 }
  0xd1   :  { %v526_v20 = vadd.f32 %v520_v7, %v480_v38  ;;  %v561_v35 = vsel %vm1176_vm3, %v557_v39, 0.0 }
  0xd2   :  { %v543_v22 = vadd.f32 %v539_v48, %v525_v3  ;;  %v569_v34 = vsel %vm132_vm4, %v561_v35, 0.0  ;;  %vm343_vm4 = vweird.f32 %v337_v59  ;;  %v593_v14 = vsel %vm592_vm11, %v692_v24, %v589_v37 }
  0xd3   :  { %v544_v1 = vadd.f32 %v539_v48, %v526_v20  ;;  %v570_v47 = vadd.f32 %v569_v34, %v560_v51  ;;  %v598_v43 = vsel %vm595_vm12, %v597_v41, %v593_v14 }
  0xd4   :  { %v547_v49 = vsub.f32 %v543_v22, %v395_v45 }
  0xd5   :  { %v548_v50 = vsub.f32 %v544_v1, %v396_v29 }
  0xd6   :  { %v558_v52 = vmul.f32 %v547_v49, %v547_v49 }
  0xd7   :  { %v559_v53 = vmul.f32 %v548_v50, %v548_v50 }
  0xd8   :  { %v562_v54 = vsel %vm554_vm5, %v558_v52, 0.0 }
  0xd9   :  { %v563_v55 = vsel %vm1176_vm3, %v559_v53, 0.0  ;;  %v571_v9 = vsel %vm323_vm14, %v562_v54, 0.0 }
  0xda   :  { %v572_v56 = vadd.f32 %v571_v9, %v570_v47  ;;  %v573_v57 = vsel %vm135_vm7, %v563_v55, 0.0  ;;  %vm345_vm7 = vmor %vm343_vm4, %vm344_vm6 }
  0xdb   :  { %v346_v15 = vsel %vm345_vm7, %v690_v2, %v342_v5 }
  0xdc   :  { %v574_v58 = vadd.f32 %v573_v57, %v572_v56  ;;  %v351_v44 = vsel %vm348_vm8, %v350_v11, %v346_v15 }
  0xde   :  { %575 = vadd.xlane.f32.xlu2 %v574_v58 }
 0x133   :  { %v329_v8 = vpop.xlane.xlu2 %328 }
 0x134   :  { %v330_v63 = vrot.slane %v329_v8, 4 }
 0x136   :  { %v331_v0 = vadd.f32 %v330_v63, %v329_v8 }
 0x138   :  { %v332_v12 = vrot.slane %v331_v0, 2 }
 0x13a   :  { %v333_v13 = vadd.f32 %v332_v12, %v331_v0 }
 0x13c   :  { %v334_v16 = vrot.slane %v333_v13, 1 }
 0x13e   :  { %v335_v18 = vadd.f32 %v334_v16, %v333_v13 }
 0x140   :  { %674 = vpush %v335_v18 }
 0x141   :  { %676 = vpush %v351_v44 }
 0x151   :  { %v576_v28 = vpop.xlane.xlu2 %575 }
 0x152   :  { %v577_v31 = vrot.slane %v576_v28, 4 }
 0x154   :  { %v578_v32 = vadd.f32 %v577_v31, %v576_v28 }
 0x156   :  { %v579_v19 = vrot.slane %v578_v32, 2 }
 0x158   :  { %v580_v26 = vadd.f32 %v579_v19, %v578_v32 }
 0x15a   :  { %v581_v23 = vrot.slane %v580_v26, 1 }
 0x15c   :  { %v582_v42 = vadd.f32 %v581_v23, %v580_v26 }
 0x15e   :  { %678 = vpush %v582_v42 }
 0x15f   :  { %680 = vpush %v598_v43 }
 0x171   :  { %s675_s21 = spop %674 }
 0x172   :  { %s677_s30 = spop %676 }
 0x173   :  { %s353_s4 = smul.f32 %s677_s30, %s675_s21 }
 0x175   :  { %355 = sst [smem:[#allocation8]] %s353_s4 }
 0x18f   :  { %s679_s14 = spop %678 }
 0x190   :  { %s681_s15 = spop %680 }
 0x191   :  { %s600_s0 = smul.f32 %s681_s15, %s679_s14 }
 0x193   :  { %602 = sst [smem:[#allocation8 + $0x1]] %s600_s0 }
 0x194   :  { %613 = dma.smem_to_vmem %s751_s16, 16, %s611_s13, [#allocation4]  }
 0x195   :  { %745 = dma.done.wait [#allocation4], 16  }
 0x196   :  { %746 = vsyncadd [#allocation4], 4294967280 }
 0x197   :  { %620 = sfence }
 0x198   :  { %621 = vsyncpa [#allocation3], 1 }
 0x199   :  { %622 = vsyncpa [#allocation6], 1 }
 0x19a   :  { %623 = vsyncpa [#allocation4], 1 }

</bundles_post_ra>
